<compile_context>
chip_gen: v5e
topology: v5e:2x2
jax: 0.10.0
libtpu: 0.0.40
codegen_flags: <defaults>
</compile_context>

<pallas_src>
import jax
import jax.numpy as jnp
from jax.experimental import pallas as pl
from jax.experimental.pallas import tpu as pltpu

C_IN, C_MID, C_OUT = 72, 32, 96
EPS = 1e-5


def _fused_kernel(x_ref, w1_ref, w2_ref, gamma_ref, beta_ref, o_ref):
    """ReLU + 1x1 conv + BatchNorm (batch stats) + 1x1 conv, fully fused.

    Layouts (channels on sublanes, flattened pixels on lanes):
      x_ref:     [N, C_IN,  HW]   io dtype (f32 or bf16)
      w1_ref:    [C_MID, C_IN]    io dtype (PyTorch [out, in], 1x1 squeezed)
      w2_ref:    [C_OUT, C_MID]   io dtype
      gamma_ref: [C_MID, 1]       f32
      beta_ref:  [C_MID, 1]       f32
      o_ref:     [N, C_OUT, HW]   io dtype
    """
    n_batch, _, hw = x_ref.shape
    io_dtype = o_ref.dtype

    # ---- Pass 1: ReLU (VPU) + conv1 (MXU, f32 acc) + BN moment sums. -------
    # z stays VMEM/vreg resident for the whole kernel; never written to HBM.
    z_per_n = []
    zsum = jnp.zeros((C_MID, 1), jnp.float32)
    zsq = jnp.zeros((C_MID, 1), jnp.float32)
    for n in range(n_batch):                         # static unroll (tiny N)
        xr = jnp.maximum(x_ref[n], 0)                # ReLU in io dtype
        z = jnp.dot(w1_ref[...], xr, preferred_element_type=jnp.float32)
        z_per_n.append(z)                            # [C_MID, HW] f32
        zsum = zsum + jnp.sum(z, axis=1, keepdims=True)
        zsq = zsq + jnp.sum(z * z, axis=1, keepdims=True)

    # ---- BN batch statistics (biased variance, PyTorch training mode). -----
    inv_count = 1.0 / float(n_batch * hw)
    mean = zsum * inv_count                                     # [C_MID, 1]
    var = jnp.maximum(zsq * inv_count - mean * mean, 0.0)       # clamp >= 0
    inv_std = jax.lax.rsqrt(var + EPS)                          # EUP
    scale = gamma_ref[...] * inv_std                            # [C_MID, 1]
    shift = beta_ref[...] - mean * scale                        # [C_MID, 1]

    # ---- Pass 2: BN affine (per-row broadcast) + conv2 (MXU, f32 acc). -----
    for n in range(n_batch):
        zn = z_per_n[n] * scale + shift                         # f32 [C_MID, HW]
        zc = zn.astype(io_dtype)                                # bf16 MXU path if io is bf16
        o = jnp.dot(w2_ref[...], zc, preferred_element_type=jnp.float32)
        o_ref[n] = o.astype(io_dtype)


def forward(x_nchw, w1_oi, gamma, beta, w2_oi):
    """x_nchw: [N, 72, H, W] (f32 or bf16); w1: [32, 72[,1,1]]; w2: [96, 32[,1,1]]."""
    n, c, h, w = x_nchw.shape
    assert c == C_IN
    hw = h * w
    io_dtype = x_nchw.dtype

    # Pure reshapes only -- no HBM transposes for any N (per review).
    x3 = x_nchw.reshape(n, C_IN, hw)
    w1 = w1_oi.reshape(C_MID, C_IN).astype(io_dtype)
    w2 = w2_oi.reshape(C_OUT, C_MID).astype(io_dtype)
    g = gamma.reshape(C_MID, 1).astype(jnp.float32)
    b = beta.reshape(C_MID, 1).astype(jnp.float32)

    itemsize = jnp.dtype(io_dtype).itemsize
    cost = pl.CostEstimate(
        flops=int(2 * n * hw * (C_IN * C_MID + C_MID * C_OUT)),
        transcendentals=int(C_MID),
        bytes_accessed=int(
            (n * hw * (C_IN + C_OUT) + C_MID * C_IN + C_OUT * C_MID) * itemsize
            + 2 * C_MID * 4),
    )

    out3 = pl.pallas_call(
        _fused_kernel,
        out_shape=jax.ShapeDtypeStruct((n, C_OUT, hw), io_dtype),
        grid=(1,),
        in_specs=[
            pl.BlockSpec((n, C_IN, hw), lambda i: (0, 0, 0)),
            pl.BlockSpec((C_MID, C_IN), lambda i: (0, 0)),
            pl.BlockSpec((C_OUT, C_MID), lambda i: (0, 0)),
            pl.BlockSpec((C_MID, 1), lambda i: (0, 0)),
            pl.BlockSpec((C_MID, 1), lambda i: (0, 0)),
        ],
        out_specs=pl.BlockSpec((n, C_OUT, hw), lambda i: (0, 0, 0)),
        compiler_params=pltpu.CompilerParams(
            dimension_semantics=("arbitrary",)),
        cost_estimate=cost,
    )(x3, w1, w2, g, b)

    return out3.reshape(n, C_OUT, h, w)


def reference(x_nchw, w1_oi, gamma, beta, w2_oi):
    """Plain-JAX f32 reference (PyTorch semantics, BN in training mode)."""
    xr = jnp.maximum(x_nchw.astype(jnp.float32), 0.0)
    z = jnp.einsum('nchw,dc->ndhw', xr, w1_oi.astype(jnp.float32))
    mean = jnp.mean(z, axis=(0, 2, 3), keepdims=True)
    var = jnp.mean((z - mean) ** 2, axis=(0, 2, 3), keepdims=True)
    zn = (z - mean) * jax.lax.rsqrt(var + EPS) * gamma.reshape(1, -1, 1, 1) \
         + beta.reshape(1, -1, 1, 1)
    return jnp.einsum('ndhw,ed->nehw', zn, w2_oi.astype(jnp.float32))


if __name__ == "__main__":
    key = jax.random.PRNGKey(0)
    kx, kw1, kw2, kg, kb, kx2 = jax.random.split(key, 6)

    # Channel counts are fixed by the module (72 -> 32 -> 96); the spatial
    # extent is reduced and a batch of 2 is used to exercise the batched
    # no-transpose path and cross-batch BN statistics.
    N, H, W = 2, 16, 16
    x = jax.random.normal(kx, (N, C_IN, H, W), dtype=jnp.float32)
    w1 = jax.random.normal(kw1, (C_MID, C_IN), dtype=jnp.float32) * 0.1
    w2 = jax.random.normal(kw2, (C_OUT, C_MID), dtype=jnp.float32) * 0.1
    gamma = 1.0 + 0.1 * jax.random.normal(kg, (C_MID,), dtype=jnp.float32)
    beta = 0.1 * jax.random.normal(kb, (C_MID,), dtype=jnp.float32)

    # --- f32 I/O (the module's native dtype), tight check ------------------
    out = jax.block_until_ready(forward(x, w1, gamma, beta, w2))
    ref = reference(x, w1, gamma, beta, w2)
    assert out.shape == (N, C_OUT, H, W)
    assert out.dtype == x.dtype
    assert jnp.allclose(out, ref, atol=2e-3, rtol=2e-3), "f32 mismatch vs reference"

    # --- bf16 I/O at the module's real spatial size (1, 72, 56, 56) --------
    # Inputs/outputs travel in bf16 (half the HBM traffic); stats stay f32.
    xb_f32 = jax.random.normal(kx2, (1, C_IN, 56, 56), dtype=jnp.float32)
    xb = xb_f32.astype(jnp.bfloat16)
    out_bf = jax.block_until_ready(
        forward(xb, w1.astype(jnp.bfloat16), gamma, beta, w2.astype(jnp.bfloat16)))
    assert out_bf.shape == (1, C_OUT, 56, 56)
    assert out_bf.dtype == jnp.bfloat16
    ref_bf = reference(xb.astype(jnp.float32), w1, gamma, beta, w2)
    diff = out_bf.astype(jnp.float32) - ref_bf
    rel_err = jnp.linalg.norm(diff) / jnp.linalg.norm(ref_bf)
    assert float(rel_err) < 3e-2, f"bf16 relative error too high: {float(rel_err)}"

    print("KERNEL_OK")
</pallas_src>

<mosaic_0001>
module attributes {stable_mosaic.version = 11 : i64} {
  func.func @_fused_kernel(%arg0: i32, %arg1: memref<2x72x256xf32, #tpu.memory_space<vmem>>, %arg2: memref<32x72xf32, #tpu.memory_space<vmem>>, %arg3: memref<96x32xf32, #tpu.memory_space<vmem>>, %arg4: memref<32x1xf32, #tpu.memory_space<vmem>>, %arg5: memref<32x1xf32, #tpu.memory_space<vmem>>, %arg6: memref<2x96x256xf32, #tpu.memory_space<vmem>>) attributes {dimension_semantics = [#tpu.dimension_semantics<arbitrary>], iteration_bounds = array<i64: 1>, scalar_prefetch = 0 : i64, scratch_operands = 0 : i64, tpu.core_type = #tpu.core_type<tc>, window_params = [{pipeline_mode = #tpu.pipeline_mode<synchronous>, transform_indices = @transform_0, window_bounds = array<i64: 2, 72, 256>}, {pipeline_mode = #tpu.pipeline_mode<synchronous>, transform_indices = @transform_1, window_bounds = array<i64: 32, 72>}, {pipeline_mode = #tpu.pipeline_mode<synchronous>, transform_indices = @transform_2, window_bounds = array<i64: 96, 32>}, {pipeline_mode = #tpu.pipeline_mode<synchronous>, transform_indices = @transform_3, window_bounds = array<i64: 32, 1>}, {pipeline_mode = #tpu.pipeline_mode<synchronous>, transform_indices = @transform_4, window_bounds = array<i64: 32, 1>}, {pipeline_mode = #tpu.pipeline_mode<synchronous>, transform_indices = @transform_5, window_bounds = array<i64: 2, 96, 256>}]} {
    %cst = arith.constant 0.000000e+00 : f32
    %0 = vector.broadcast %cst : f32 to vector<32x1xf32>
    %cst_0 = arith.constant 0.000000e+00 : f32
    %1 = vector.broadcast %cst_0 : f32 to vector<32x1xf32>
    %c0 = arith.constant 0 : index
    %c0_1 = arith.constant 0 : index
    %c0_2 = arith.constant 0 : index
    %2 = vector.load %arg1[%c0, %c0_1, %c0_2] : memref<2x72x256xf32, #tpu.memory_space<vmem>>, vector<1x72x256xf32>
    %3 = vector.shape_cast %2 : vector<1x72x256xf32> to vector<72x256xf32>
    %cst_3 = arith.constant 0.000000e+00 : f32
    %4 = vector.broadcast %cst_3 : f32 to vector<72x256xf32>
    %5 = arith.maximumf %3, %4 : vector<72x256xf32>
    %c0_4 = arith.constant 0 : index
    %c0_5 = arith.constant 0 : index
    %6 = vector.load %arg2[%c0_4, %c0_5] : memref<32x72xf32, #tpu.memory_space<vmem>>, vector<32x72xf32>
    %cst_6 = arith.constant dense<0.000000e+00> : vector<32x256xf32>
    %7 = tpu.matmul %6, %5, %cst_6 {dimension_numbers = #tpu.dot_dimension_numbers<[1], [0], [0], [1], [0, 0, 1, 1], [], []>} : vector<32x72xf32>, vector<72x256xf32>, vector<32x256xf32> -> vector<32x256xf32>
    %cst_7 = arith.constant dense<0.000000e+00> : vector<32xf32>
    %8 = vector.multi_reduction <add>, %7, %cst_7 [1] : vector<32x256xf32> to vector<32xf32>
    %9 = vector.shape_cast %8 : vector<32xf32> to vector<32x1xf32>
    %10 = arith.addf %0, %9 : vector<32x1xf32>
    %11 = arith.mulf %7, %7 : vector<32x256xf32>
    %cst_8 = arith.constant dense<0.000000e+00> : vector<32xf32>
    %12 = vector.multi_reduction <add>, %11, %cst_8 [1] : vector<32x256xf32> to vector<32xf32>
    %13 = vector.shape_cast %12 : vector<32xf32> to vector<32x1xf32>
    %14 = arith.addf %1, %13 : vector<32x1xf32>
    %c1 = arith.constant 1 : index
    %c0_9 = arith.constant 0 : index
    %c0_10 = arith.constant 0 : index
    %15 = vector.load %arg1[%c1, %c0_9, %c0_10] : memref<2x72x256xf32, #tpu.memory_space<vmem>>, vector<1x72x256xf32>
    %16 = vector.shape_cast %15 : vector<1x72x256xf32> to vector<72x256xf32>
    %cst_11 = arith.constant 0.000000e+00 : f32
    %17 = vector.broadcast %cst_11 : f32 to vector<72x256xf32>
    %18 = arith.maximumf %16, %17 : vector<72x256xf32>
    %c0_12 = arith.constant 0 : index
    %c0_13 = arith.constant 0 : index
    %19 = vector.load %arg2[%c0_12, %c0_13] : memref<32x72xf32, #tpu.memory_space<vmem>>, vector<32x72xf32>
    %cst_14 = arith.constant dense<0.000000e+00> : vector<32x256xf32>
    %20 = tpu.matmul %19, %18, %cst_14 {dimension_numbers = #tpu.dot_dimension_numbers<[1], [0], [0], [1], [0, 0, 1, 1], [], []>} : vector<32x72xf32>, vector<72x256xf32>, vector<32x256xf32> -> vector<32x256xf32>
    %cst_15 = arith.constant dense<0.000000e+00> : vector<32xf32>
    %21 = vector.multi_reduction <add>, %20, %cst_15 [1] : vector<32x256xf32> to vector<32xf32>
    %22 = vector.shape_cast %21 : vector<32xf32> to vector<32x1xf32>
    %23 = arith.addf %10, %22 : vector<32x1xf32>
    %24 = arith.mulf %20, %20 : vector<32x256xf32>
    %cst_16 = arith.constant dense<0.000000e+00> : vector<32xf32>
    %25 = vector.multi_reduction <add>, %24, %cst_16 [1] : vector<32x256xf32> to vector<32xf32>
    %26 = vector.shape_cast %25 : vector<32xf32> to vector<32x1xf32>
    %27 = arith.addf %14, %26 : vector<32x1xf32>
    %cst_17 = arith.constant 0.001953125 : f32
    %28 = vector.broadcast %cst_17 : f32 to vector<32x1xf32>
    %29 = arith.mulf %23, %28 : vector<32x1xf32>
    %cst_18 = arith.constant 0.001953125 : f32
    %30 = vector.broadcast %cst_18 : f32 to vector<32x1xf32>
    %31 = arith.mulf %27, %30 : vector<32x1xf32>
    %32 = arith.mulf %29, %29 : vector<32x1xf32>
    %33 = arith.subf %31, %32 : vector<32x1xf32>
    %cst_19 = arith.constant 0.000000e+00 : f32
    %34 = vector.broadcast %cst_19 : f32 to vector<32x1xf32>
    %35 = arith.maximumf %33, %34 : vector<32x1xf32>
    %cst_20 = arith.constant 9.99999974E-6 : f32
    %36 = vector.broadcast %cst_20 : f32 to vector<32x1xf32>
    %37 = arith.addf %35, %36 : vector<32x1xf32>
    %38 = math.rsqrt %37 : vector<32x1xf32>
    %c0_21 = arith.constant 0 : index
    %c0_22 = arith.constant 0 : index
    %39 = vector.load %arg4[%c0_21, %c0_22] : memref<32x1xf32, #tpu.memory_space<vmem>>, vector<32x1xf32>
    %40 = arith.mulf %39, %38 : vector<32x1xf32>
    %c0_23 = arith.constant 0 : index
    %c0_24 = arith.constant 0 : index
    %41 = vector.load %arg5[%c0_23, %c0_24] : memref<32x1xf32, #tpu.memory_space<vmem>>, vector<32x1xf32>
    %42 = arith.mulf %29, %40 : vector<32x1xf32>
    %43 = arith.subf %41, %42 : vector<32x1xf32>
    %44 = vector.broadcast %40 : vector<32x1xf32> to vector<32x256xf32>
    %45 = arith.mulf %7, %44 : vector<32x256xf32>
    %46 = vector.broadcast %43 : vector<32x1xf32> to vector<32x256xf32>
    %47 = arith.addf %45, %46 : vector<32x256xf32>
    %c0_25 = arith.constant 0 : index
    %c0_26 = arith.constant 0 : index
    %48 = vector.load %arg3[%c0_25, %c0_26] : memref<96x32xf32, #tpu.memory_space<vmem>>, vector<96x32xf32>
    %cst_27 = arith.constant dense<0.000000e+00> : vector<96x256xf32>
    %49 = tpu.matmul %48, %47, %cst_27 {dimension_numbers = #tpu.dot_dimension_numbers<[1], [0], [0], [1], [0, 0, 1, 1], [], []>} : vector<96x32xf32>, vector<32x256xf32>, vector<96x256xf32> -> vector<96x256xf32>
    %c0_28 = arith.constant 0 : index
    %c0_29 = arith.constant 0 : index
    %c0_30 = arith.constant 0 : index
    %50 = vector.load %arg6[%c0_28, %c0_29, %c0_30] : memref<2x96x256xf32, #tpu.memory_space<vmem>>, vector<1x96x256xf32>
    %51 = vector.shape_cast %50 : vector<1x96x256xf32> to vector<96x256xf32>
    %52 = vector.shape_cast %49 : vector<96x256xf32> to vector<1x96x256xf32>
    tpu.vector_store %arg6[%c0_28, %c0_29, %c0_30], %52 {strides = array<i32>} : memref<2x96x256xf32, #tpu.memory_space<vmem>>, vector<1x96x256xf32>,
    %53 = vector.broadcast %40 : vector<32x1xf32> to vector<32x256xf32>
    %54 = arith.mulf %20, %53 : vector<32x256xf32>
    %55 = vector.broadcast %43 : vector<32x1xf32> to vector<32x256xf32>
    %56 = arith.addf %54, %55 : vector<32x256xf32>
    %c0_31 = arith.constant 0 : index
    %c0_32 = arith.constant 0 : index
    %57 = vector.load %arg3[%c0_31, %c0_32] : memref<96x32xf32, #tpu.memory_space<vmem>>, vector<96x32xf32>
    %cst_33 = arith.constant dense<0.000000e+00> : vector<96x256xf32>
    %58 = tpu.matmul %57, %56, %cst_33 {dimension_numbers = #tpu.dot_dimension_numbers<[1], [0], [0], [1], [0, 0, 1, 1], [], []>} : vector<96x32xf32>, vector<32x256xf32>, vector<96x256xf32> -> vector<96x256xf32>
    %c1_34 = arith.constant 1 : index
    %c0_35 = arith.constant 0 : index
    %c0_36 = arith.constant 0 : index
    %59 = vector.load %arg6[%c1_34, %c0_35, %c0_36] : memref<2x96x256xf32, #tpu.memory_space<vmem>>, vector<1x96x256xf32>
    %60 = vector.shape_cast %59 : vector<1x96x256xf32> to vector<96x256xf32>
    %61 = vector.shape_cast %58 : vector<96x256xf32> to vector<1x96x256xf32>
    tpu.vector_store %arg6[%c1_34, %c0_35, %c0_36], %61 {strides = array<i32>} : memref<2x96x256xf32, #tpu.memory_space<vmem>>, vector<1x96x256xf32>,
    return
  }
  func.func @transform_0(%arg0: i32) -> (i32, i32, i32) {
    %c0_i32 = arith.constant 0 : i32
    %c0_i32_0 = arith.constant 0 : i32
    %c0_i32_1 = arith.constant 0 : i32
    %c0_i32_2 = arith.constant 0 : i32
    return %c0_i32, %c0_i32_0, %c0_i32_1 : i32, i32, i32
  }
  func.func @transform_1(%arg0: i32) -> (i32, i32) {
    %c0_i32 = arith.constant 0 : i32
    %c0_i32_0 = arith.constant 0 : i32
    %c0_i32_1 = arith.constant 0 : i32
    return %c0_i32, %c0_i32_0 : i32, i32
  }
  func.func @transform_2(%arg0: i32) -> (i32, i32) {
    %c0_i32 = arith.constant 0 : i32
    %c0_i32_0 = arith.constant 0 : i32
    %c0_i32_1 = arith.constant 0 : i32
    return %c0_i32, %c0_i32_0 : i32, i32
  }
  func.func @transform_3(%arg0: i32) -> (i32, i32) {
    %c0_i32 = arith.constant 0 : i32
    %c0_i32_0 = arith.constant 0 : i32
    %c0_i32_1 = arith.constant 0 : i32
    return %c0_i32, %c0_i32_0 : i32, i32
  }
  func.func @transform_4(%arg0: i32) -> (i32, i32) {
    %c0_i32 = arith.constant 0 : i32
    %c0_i32_0 = arith.constant 0 : i32
    %c0_i32_1 = arith.constant 0 : i32
    return %c0_i32, %c0_i32_0 : i32, i32
  }
  func.func @transform_5(%arg0: i32) -> (i32, i32, i32) {
    %c0_i32 = arith.constant 0 : i32
    %c0_i32_0 = arith.constant 0 : i32
    %c0_i32_1 = arith.constant 0 : i32
    %c0_i32_2 = arith.constant 0 : i32
    return %c0_i32, %c0_i32_0, %c0_i32_1 : i32, i32, i32
  }
}

</mosaic_0001>

<bundles_post_ra>
// kernel: tpu_custom_call.1
= control target key start
LH: loop header
LB: loop body
LE: loop exit
PB: predicated region body
PF: predicated region fallthrough
CT: control target
= control target key end

     0   :  { %10 = vsyncpa [#allocation3], 0  ;;  %s1287_s0 = inlined_call_operand.hbm [shape: f32[2,72,256], index: 0, kind: input, shape index: {}]   ;;  %s1288_s1 = inlined_call_operand.vmem [shape: f32[32,72], index: 1, kind: input, shape index: {}]   ;;  %s1289_s2 = inlined_call_operand.vmem [shape: f32[96,32], index: 2, kind: input, shape index: {}]   ;;  %s1290_s3 = inlined_call_operand.vmem [shape: f32[32,1], index: 3, kind: input, shape index: {}]   ;;  %s1291_s4 = inlined_call_operand.vmem [shape: f32[32,1], index: 4, kind: input, shape index: {}]   ;;  %s1292_s5 = inlined_call_operand.hbm [shape: f32[2,96,256], index: 5, kind: output, shape index: {}]  }
   0x1   :  { %11 = vsyncpa [#allocation4], 0  ;;  %s16_s20 = sshll.u32 %s1287_s0, 4  ;;  %s988_s21 = smov [#allocation2]   ;;  %s17_s20 = int_to_ptr.hbm [resolvable:$true] %s16_s20 }
   0x2   :  { %s18_s22 = sshll.u32 %s988_s21, 4  ;;  %s989_s23 = smov 256   ;;  %s19_s22 = int_to_ptr.vmem [resolvable:$true] %s18_s22 }
   0x3   :  { %s990_s24 = smov 16  }
   0x4   :  { %24 = dma.hbm_to_vmem [thread:$0]  %s17_s20, 4608, %s19_s22, [#allocation3], %s989_s23, %s989_s23, %s990_s24  }
   0x5   :  { %984 = dma.done.wait [#allocation3], 4608  }
   0x6   :  { %985 = vsyncadd [#allocation3], 4294962688  ;;  %v53_v0 = vld [vmem:[#allocation2 + $0x80] sm:$0xff]  ;;  %v54_v1 = vld [vmem:[#allocation2 + $0x88] sm:$0xff]  ;;  %vm77_vm0 = vcmask 588800   ;;  %vm475_vm13 = vcmask 261120  }
   0x7   :  { %v205_v2 = vld [vmem:[#allocation2 + $0x110] sm:$0xff]  ;;  %v71_v3 = vmax.f32 %v53_v0, 0.0  ;;  %v72_v4 = vmax.f32 %v54_v1, 0.0  ;;  %v206_v6 = vld [vmem:[#allocation2 + $0x118] sm:$0xff]  ;;  %v203_v12 = vld [vmem:[#allocation2 + $0x100] sm:$0xff] }
   0x8   :  { %v223_v5 = vmax.f32 %v205_v2, 0.0  ;;  %v51_v7 = vld [vmem:[#allocation2 + $0x70] sm:$0xff]  ;;  %v52_v8 = vld [vmem:[#allocation2 + $0x78] sm:$0xff]  ;;  %v224_v9 = vmax.f32 %v206_v6, 0.0  ;;  %v204_v13 = vld [vmem:[#allocation2 + $0x108] sm:$0xff]  ;;  %v221_v15 = vmax.f32 %v203_v12, 0.0 }
   0x9   :  { %v69_v10 = vmax.f32 %v51_v7, 0.0  ;;  %v70_v11 = vmax.f32 %v52_v8, 0.0  ;;  %v49_v14 = vld [vmem:[#allocation2 + $0x60] sm:$0xff]  ;;  %97 = vmatpush.msra.mxu0 %v71_v3  ;;  %126 = vmatpush.msra.mxu1 %v72_v4  ;;  %v222_v16 = vmax.f32 %v204_v13, 0.0  ;;  %v50_v18 = vld [vmem:[#allocation2 + $0x68] sm:$0xff]  ;;  %v201_v19 = vld [vmem:[#allocation2 + $0xf0] sm:$0xff] }
   0xa   :  { %v67_v17 = vmax.f32 %v49_v14, 0.0  ;;  %v202_v20 = vld [vmem:[#allocation2 + $0xf8] sm:$0xff]  ;;  %232 = vmatpush.msra.mxu2 %v223_v5  ;;  %261 = vmatpush.msra.mxu3 %v224_v9  ;;  %v68_v21 = vmax.f32 %v50_v18, 0.0  ;;  %v219_v22 = vmax.f32 %v201_v19, 0.0  ;;  %v47_v24 = vld [vmem:[#allocation2 + $0x50] sm:$0xff]  ;;  %v199_v26 = vld [vmem:[#allocation2 + $0xe0] sm:$0xff] }
   0xb   :  { %v220_v23 = vmax.f32 %v202_v20, 0.0  ;;  %v48_v25 = vld [vmem:[#allocation2 + $0x58] sm:$0xff]  ;;  %98 = vmatpush.msra.mxu0 %v69_v10  ;;  %127 = vmatpush.msra.mxu1 %v70_v11  ;;  %v65_v27 = vmax.f32 %v47_v24, 0.0  ;;  %v200_v29 = vld [vmem:[#allocation2 + $0xe8] sm:$0xff]  ;;  %v45_v30 = vld [vmem:[#allocation2 + $0x40] sm:$0xff]  ;;  %v217_v32 = vmax.f32 %v199_v26, 0.0 }
   0xc   :  { %v66_v28 = vmax.f32 %v48_v25, 0.0  ;;  %v46_v31 = vld [vmem:[#allocation2 + $0x48] sm:$0xff]  ;;  %233 = vmatpush.msra.mxu2 %v221_v15  ;;  %262 = vmatpush.msra.mxu3 %v222_v16  ;;  %v218_v33 = vmax.f32 %v200_v29, 0.0  ;;  %v197_v34 = vld [vmem:[#allocation2 + $0xd0] sm:$0xff]  ;;  %v198_v35 = vld [vmem:[#allocation2 + $0xd8] sm:$0xff]  ;;  %v63_v37 = vmax.f32 %v45_v30, 0.0 }
   0xd   :  { %v43_v36 = vld [vmem:[#allocation2 + $0x30] sm:$0xff]  ;;  %99 = vmatpush.msra.mxu0 %v67_v17  ;;  %128 = vmatpush.msra.mxu1 %v68_v21  ;;  %v64_v38 = vmax.f32 %v46_v31, 0.0  ;;  %v44_v39 = vld [vmem:[#allocation2 + $0x38] sm:$0xff]  ;;  %v195_v40 = vld [vmem:[#allocation2 + $0xc0] sm:$0xff]  ;;  %v215_v42 = vmax.f32 %v197_v34, 0.0  ;;  %v216_v43 = vmax.f32 %v198_v35, 0.0 }
   0xe   :  { %v196_v41 = vld [vmem:[#allocation2 + $0xc8] sm:$0xff]  ;;  %234 = vmatpush.msra.mxu2 %v219_v22  ;;  %263 = vmatpush.msra.mxu3 %v220_v23  ;;  %v41_v44 = vld [vmem:[#allocation2 + $0x20] sm:$0xff]  ;;  %v61_v46 = vmax.f32 %v43_v36, 0.0  ;;  %v62_v47 = vmax.f32 %v44_v39, 0.0  ;;  %v193_v48 = vld [vmem:[#allocation2 + $0xb0] sm:$0xff]  ;;  %v213_v50 = vmax.f32 %v195_v40, 0.0 }
   0xf   :  { %v42_v45 = vld [vmem:[#allocation2 + $0x28] sm:$0xff]  ;;  %100 = vmatpush.msra.mxu0 %v65_v27  ;;  %129 = vmatpush.msra.mxu1 %v66_v28  ;;  %v194_v49 = vld [vmem:[#allocation2 + $0xb8] sm:$0xff]  ;;  %v214_v51 = vmax.f32 %v196_v41, 0.0  ;;  %v39_v52 = vld [vmem:[#allocation2 + $0x10] sm:$0xff]  ;;  %v59_v54 = vmax.f32 %v41_v44, 0.0  ;;  %v211_v58 = vmax.f32 %v193_v48, 0.0 }
  0x10   :  { %235 = vmatpush.msra.mxu2 %v217_v32  ;;  %264 = vmatpush.msra.mxu3 %v218_v33  ;;  %v40_v53 = vld [vmem:[#allocation2 + $0x18] sm:$0xff]  ;;  %v60_v55 = vmax.f32 %v42_v45, 0.0  ;;  %v191_v56 = vld [vmem:[#allocation2 + $0xa0] sm:$0xff]  ;;  %v192_v57 = vld [vmem:[#allocation2 + $0xa8] sm:$0xff]  ;;  %v212_v59 = vmax.f32 %v194_v49, 0.0  ;;  %v57_v62 = vmax.f32 %v39_v52, 0.0 }
  0x11   :  { %101 = vmatpush.msra.mxu0 %v63_v37  ;;  %130 = vmatpush.msra.mxu1 %v64_v38  ;;  %v37_v60 = vld [vmem:[#allocation2] sm:$0xff]  ;;  %v38_v61 = vld [vmem:[#allocation2 + $0x8] sm:$0xff]  ;;  %v58_v63 = vmax.f32 %v40_v53, 0.0  ;;  %v189_v0 = vld [vmem:[#allocation2 + $0x90] sm:$0xff]  ;;  %v209_v2 = vmax.f32 %v191_v56, 0.0  ;;  %v210_v3 = vmax.f32 %v192_v57, 0.0 }
  0x12   :  { %236 = vmatpush.msra.mxu2 %v215_v42  ;;  %265 = vmatpush.msra.mxu3 %v216_v43  ;;  %v190_v1 = vld [vmem:[#allocation2 + $0x98] sm:$0xff]  ;;  %v55_v4 = vmax.f32 %v37_v60, 0.0  ;;  %v56_v5 = vmax.f32 %v38_v61, 0.0  ;;  %v207_v6 = vmax.f32 %v189_v0, 0.0  ;;  %v73_v8 = vld [vmem:[%s1288_s1] sm:$0xff]  ;;  %v74_v9 = vld [vmem:[%s1288_s1 + $0x8] sm:$0xff] }
  0x13   :  { %102 = vmatpush.msra.mxu0 %v61_v46  ;;  %131 = vmatpush.msra.mxu1 %v62_v47  ;;  %v208_v7 = vmax.f32 %v190_v1, 0.0  ;;  %v75_v10 = vld [vmem:[%s1288_s1 + $0x10] sm:$0xff]  ;;  %v76_v11 = vld [vmem:[%s1288_s1 + $0x18] sm:$0xff] }
  0x14   :  { %237 = vmatpush.msra.mxu2 %v213_v50  ;;  %266 = vmatpush.msra.mxu3 %v214_v51 }
  0x15   :  { %103 = vmatpush.msra.mxu0 %v59_v54  ;;  %132 = vmatpush.msra.mxu1 %v60_v55 }
  0x16   :  { %238 = vmatpush.msra.mxu2 %v211_v58  ;;  %267 = vmatpush.msra.mxu3 %v212_v59 }
  0x17   :  { %104 = vmatpush.msra.mxu0 %v57_v62  ;;  %133 = vmatpush.msra.mxu1 %v58_v63 }
  0x18   :  { %239 = vmatpush.msra.mxu2 %v209_v2  ;;  %268 = vmatpush.msra.mxu3 %v210_v3 }
  0x19   :  { %105 = vmatpush.msra.mxu0 %v55_v4  ;;  %134 = vmatpush.msra.mxu1 %v56_v5 }
  0x1a   :  { %240 = vmatpush.msra.mxu2 %v207_v6  ;;  %269 = vmatpush.msra.mxu3 %v208_v7  ;;  %v991_v7 = vmov 0  }
  0x1b   :  { %856 = vmatmul.msk.f32.vlgmr.msra.gmra.mxu0 %vm77_vm0, %v73_v8  ;;  %860 = vmatmul.msk.f32.vlgmr.msra.gmra.mxu1 %vm77_vm0, %v73_v8 }
  0x1c   :  { %864 = vmatmul.msk.f32.vlgmr.msra.gmra.mxu2 %vm77_vm0, %v73_v8  ;;  %868 = vmatmul.msk.f32.vlgmr.msra.gmra.mxu3 %vm77_vm0, %v73_v8 }
  0x1d   :  { %925 = vset.pattern.permute.xlu2 %v991_v7  ;;  %926 = vset.pattern.permute.xlu1 %v991_v7 }
  0x1e   :  { %927 = vset.pattern.permute.xlu0 %v991_v7 }
  0x23   :  { %857 = vmatmul.msk.f32.gmra.mxu0 %vm77_vm0, %v74_v9  ;;  %861 = vmatmul.msk.f32.gmra.mxu1 %vm77_vm0, %v74_v9 }
  0x24   :  { %865 = vmatmul.msk.f32.gmra.mxu2 %vm77_vm0, %v74_v9  ;;  %869 = vmatmul.msk.f32.gmra.mxu3 %vm77_vm0, %v74_v9 }
  0x2b   :  { %858 = vmatmul.msk.f32.gmra.mxu0 %vm77_vm0, %v75_v10  ;;  %862 = vmatmul.msk.f32.gmra.mxu1 %vm77_vm0, %v75_v10 }
  0x2c   :  { %866 = vmatmul.msk.f32.gmra.mxu2 %vm77_vm0, %v75_v10  ;;  %870 = vmatmul.msk.f32.gmra.mxu3 %vm77_vm0, %v75_v10 }
  0x33   :  { %859 = vmatmul.msk.f32.gmra.mxu0 %vm77_vm0, %v76_v11  ;;  %863 = vmatmul.msk.f32.gmra.mxu1 %vm77_vm0, %v76_v11 }
  0x34   :  { %867 = vmatmul.msk.f32.gmra.mxu2 %vm77_vm0, %v76_v11  ;;  %871 = vmatmul.msk.f32.gmra.mxu3 %vm77_vm0, %v76_v11 }
  0x98   :  { %v1057_v12 = vpop.f32.mrf.mxu0  ;;  %v1059_v13 = vpop.f32.mrf.mxu1 }
  0x99   :  { %v148_v14 = vadd.f32 %v1059_v13, %v1057_v12  ;;  %v164_v53 = vmul.f32 %v1057_v12, %v1057_v12  ;;  %v165_v54 = vmul.f32 %v1059_v13, %v1059_v13 }
  0x9b   :  { %149 = vadd.xlane.f32.xlu1 %v148_v14  ;;  %v172_v56 = vadd.f32 %v165_v54, %v164_v53 }
  0x9f   :  { %v1063_v15 = vpop.f32.mrf.mxu2  ;;  %v1065_v16 = vpop.f32.mrf.mxu3 }
  0xa0   :  { %v1067_v17 = vpop.f32.mrf.mxu0  ;;  %v1069_v18 = vpop.f32.mrf.mxu1  ;;  %v283_v19 = vadd.f32 %v1065_v16, %v1063_v15  ;;  %v299_v57 = vmul.f32 %v1063_v15, %v1063_v15  ;;  %v300_v58 = vmul.f32 %v1065_v16, %v1065_v16 }
  0xa1   :  { %v166_v20 = vmul.f32 %v1067_v17, %v1067_v17  ;;  %v167_v21 = vmul.f32 %v1069_v18, %v1069_v18  ;;  %v151_v27 = vadd.f32 %v1069_v18, %v1067_v17 }
  0xa2   :  { %284 = vadd.xlane.f32.xlu0 %v283_v19  ;;  %v307_v59 = vadd.f32 %v300_v58, %v299_v57 }
  0xa3   :  { %v175_v22 = vadd.f32 %v167_v21, %v166_v20 }
  0xa5   :  { %176 = vadd.xlane.f32.xlu2 %v175_v22 }
  0xa7   :  { %v1077_v23 = vpop.f32.mrf.mxu2  ;;  %v1079_v24 = vpop.f32.mrf.mxu3 }
  0xa8   :  { %v1081_v25 = vpop.f32.mrf.mxu0  ;;  %v1083_v26 = vpop.f32.mrf.mxu1  ;;  %v286_v29 = vadd.f32 %v1079_v24, %v1077_v23  ;;  %v301_v50 = vmul.f32 %v1077_v23, %v1077_v23  ;;  %v302_v51 = vmul.f32 %v1079_v24, %v1079_v24 }
  0xa9   :  { %v154_v28 = vadd.f32 %v1083_v26, %v1081_v25  ;;  %v168_v30 = vmul.f32 %v1081_v25, %v1081_v25  ;;  %v169_v31 = vmul.f32 %v1083_v26, %v1083_v26 }
  0xaa   :  { %152 = vadd.xlane.f32.xlu0 %v151_v27  ;;  %v310_v55 = vadd.f32 %v302_v51, %v301_v50 }
  0xab   :  { %155 = vadd.xlane.f32.xlu1 %v154_v28  ;;  %v178_v36 = vadd.f32 %v169_v31, %v168_v30 }
  0xad   :  { %287 = vadd.xlane.f32.xlu2 %v286_v29 }
  0xaf   :  { %v1095_v32 = vpop.f32.mrf.mxu2  ;;  %v1097_v33 = vpop.f32.mrf.mxu3 }
  0xb0   :  { %v1099_v34 = vpop.f32.mrf.mxu0  ;;  %v1101_v35 = vpop.f32.mrf.mxu1  ;;  %v289_v38 = vadd.f32 %v1097_v33, %v1095_v32  ;;  %v303_v39 = vmul.f32 %v1095_v32, %v1095_v32  ;;  %v304_v40 = vmul.f32 %v1097_v33, %v1097_v33 }
  0xb1   :  { %v157_v37 = vadd.f32 %v1101_v35, %v1099_v34  ;;  %v170_v41 = vmul.f32 %v1099_v34, %v1099_v34  ;;  %v171_v42 = vmul.f32 %v1101_v35, %v1101_v35 }
  0xb2   :  { %v313_v45 = vadd.f32 %v304_v40, %v303_v39 }
  0xb3   :  { %179 = vadd.xlane.f32.xlu1 %v178_v36  ;;  %158 = vadd.xlane.f32.xlu0 %v157_v37  ;;  %v181_v48 = vadd.f32 %v171_v42, %v170_v41 }
  0xb5   :  { %290 = vadd.xlane.f32.xlu2 %v289_v38 }
  0xb7   :  { %v1115_v43 = vpop.f32.mrf.mxu2  ;;  %v1117_v44 = vpop.f32.mrf.mxu3 }
  0xb8   :  { %v305_v46 = vmul.f32 %v1115_v43, %v1115_v43  ;;  %v306_v47 = vmul.f32 %v1117_v44, %v1117_v44  ;;  %v292_v52 = vadd.f32 %v1117_v44, %v1115_v43 }
  0xba   :  { %v316_v49 = vadd.f32 %v306_v47, %v305_v46 }
  0xbb   :  { %182 = vadd.xlane.f32.xlu1 %v181_v48  ;;  %314 = vadd.xlane.f32.xlu0 %v313_v45 }
  0xbd   :  { %317 = vadd.xlane.f32.xlu2 %v316_v49 }
  0xc3   :  { %311 = vadd.xlane.f32.xlu1 %v310_v55  ;;  %293 = vadd.xlane.f32.xlu0 %v292_v52 }
  0xc5   :  { %173 = vadd.xlane.f32.xlu2 %v172_v56 }
  0xcb   :  { %308 = vadd.xlane.f32.xlu0 %v307_v59 }
 0x10e   :  { %v150_v61 = vpop.xlane.xlu1 %149 }
 0x115   :  { %v285_v60 = vpop.xlane.xlu0 %284 }
 0x116   :  { %v295_v38 = vadd.f32 %v285_v60, %v150_v61 }
 0x118   :  { %v177_v62 = vpop.xlane.xlu2 %176  ;;  %v1149_v47 = vmul.f32 0.001953125, %v295_v38 }
 0x11a   :  { %v331_v57 = vmul.f32 %v1149_v47, %v1149_v47 }
 0x11d   :  { %v153_v63 = vpop.xlane.xlu0 %152 }
 0x11e   :  { %v156_v0 = vpop.xlane.xlu1 %155 }
 0x120   :  { %v288_v1 = vpop.xlane.xlu2 %287 }
 0x121   :  { %v296_v11 = vadd.f32 %v288_v1, %v153_v63 }
 0x123   :  { %v1141_v22 = vmul.f32 0.001953125, %v296_v11 }
 0x125   :  { %v332_v39 = vmul.f32 %v1141_v22, %v1141_v22 }
 0x126   :  { %v180_v2 = vpop.xlane.xlu1 %179  ;;  %v159_v3 = vpop.xlane.xlu0 %158 }
 0x128   :  { %v291_v4 = vpop.xlane.xlu2 %290 }
 0x129   :  { %v297_v5 = vadd.f32 %v291_v4, %v156_v0 }
 0x12b   :  { %v1137_v6 = vmul.f32 0.001953125, %v297_v5  ;;  %v389_v5 = vld [vmem:[%s1290_s3 + $0x10] sm:$0xff] }
 0x12d   :  { %v333_v14 = vmul.f32 %v1137_v6, %v1137_v6 }
 0x12e   :  { %v183_v8 = vpop.xlane.xlu1 %182  ;;  %v315_v9 = vpop.xlane.xlu0 %314 }
 0x12f   :  { %v321_v10 = vadd.f32 %v315_v9, %v180_v2 }
 0x130   :  { %v318_v21 = vpop.xlane.xlu2 %317 }
 0x131   :  { %v329_v19 = vmul.f32 0.001953125, %v321_v10  ;;  %v322_v31 = vadd.f32 %v318_v21, %v183_v8 }
 0x133   :  { %v337_v20 = vsub.f32 %v329_v19, %v333_v14  ;;  %v330_v42 = vmul.f32 0.001953125, %v322_v31  ;;  %v388_v31 = vld [vmem:[%s1290_s3 + $0x8] sm:$0xff] }
 0x135   :  { %v341_v27 = vmax.f32 %v337_v20, 0.0 }
 0x136   :  { %v312_v28 = vpop.xlane.xlu1 %311  ;;  %v294_v29 = vpop.xlane.xlu0 %293 }
 0x137   :  { %v345_v30 = vadd.f32 1e-05, %v341_v27  ;;  %v320_v36 = vadd.f32 %v312_v28, %v177_v62  ;;  %v298_v37 = vadd.f32 %v294_v29, %v159_v3 }
 0x138   :  { %v174_v50 = vpop.xlane.xlu2 %173 }
 0x139   :  { %928 = vrsqrt.f32 %v345_v30  ;;  %v328_v40 = vmul.f32 0.001953125, %v320_v36  ;;  %v1145_v41 = vmul.f32 0.001953125, %v298_v37  ;;  %vm373_vm2 = vweird.f32 %v345_v30  ;;  %v390_v36 = vld [vmem:[%s1290_s3 + $0x18] sm:$0xff] }
 0x13b   :  { %v336_v45 = vsub.f32 %v328_v40, %v332_v39  ;;  %v334_v46 = vmul.f32 %v1145_v41, %v1145_v41 }
 0x13d   :  { %v340_v48 = vmax.f32 %v336_v45, 0.0  ;;  %v338_v49 = vsub.f32 %v330_v42, %v334_v46 }
 0x13e   :  { %v309_v51 = vpop.xlane.xlu0 %308 }
 0x13f   :  { %v929_v52 = vpop.eup %928  ;;  %v344_v53 = vadd.f32 1e-05, %v340_v48  ;;  %v342_v54 = vmax.f32 %v338_v49, 0.0  ;;  %v319_v55 = vadd.f32 %v309_v51, %v174_v50  ;;  %v398_v48 = vld [vmem:[%s1291_s4 + $0x18] sm:$0xff] }
 0x140   :  { %v368_v56 = vmul.f32 %v929_v52, %v345_v30  ;;  %vm374_vm1 = vweird.f32 %v929_v52 }
 0x141   :  { %930 = vrsqrt.f32 %v344_v53  ;;  %v346_v58 = vadd.f32 1e-05, %v342_v54  ;;  %v327_v59 = vmul.f32 0.001953125, %v319_v55  ;;  %vm375_vm3 = vmor %vm373_vm2, %vm374_vm1  ;;  %vm363_vm5 = vweird.f32 %v344_v53 }
 0x142   :  { %v369_v60 = vmul.f32 %v929_v52, %v368_v56  ;;  %v397_v56 = vld [vmem:[%s1291_s4 + $0x10] sm:$0xff] }
 0x143   :  { %932 = vrsqrt.f32 %v346_v58  ;;  %v335_v61 = vsub.f32 %v327_v59, %v331_v57  ;;  %vm383_vm8 = vweird.f32 %v346_v58  ;;  %v395_v59 = vld [vmem:[%s1291_s4] sm:$0xff] }
 0x144   :  { %v370_v62 = vmul.f32 0.5, %v369_v60 }
 0x145   :  { %v339_v63 = vmax.f32 %v335_v61, 0.0 }
 0x146   :  { %v371_v0 = vsub.f32 1.5, %v370_v62 }
 0x147   :  { %v931_v1 = vpop.eup %930  ;;  %v343_v2 = vadd.f32 1e-05, %v339_v63 }
 0x148   :  { %v358_v3 = vmul.f32 %v931_v1, %v344_v53  ;;  %v372_v4 = vmul.f32 %v929_v52, %v371_v0  ;;  %vm364_vm4 = vweird.f32 %v931_v1 }
 0x149   :  { %v933_v7 = vpop.eup %932  ;;  %934 = vrsqrt.f32 %v343_v2  ;;  %vm365_vm7 = vmor %vm363_vm5, %vm364_vm4  ;;  %vm353_vm11 = vweird.f32 %v343_v2 }
 0x14a   :  { %v359_v8 = vmul.f32 %v931_v1, %v358_v3  ;;  %v378_v9 = vmul.f32 %v933_v7, %v346_v58  ;;  %v376_v10 = vsel %vm375_vm3, %v929_v52, %v372_v4  ;;  %vm384_vm6 = vweird.f32 %v933_v7  ;;  %v387_v52 = vld [vmem:[%s1290_s3] sm:$0xff] }
 0x14b   :  { %v393_v11 = vmul.f32 %v389_v5, %v376_v10  ;;  %vm385_vm9 = vmor %vm383_vm8, %vm384_vm6 }
 0x14c   :  { %v360_v14 = vmul.f32 0.5, %v359_v8  ;;  %v379_v19 = vmul.f32 %v933_v7, %v378_v9 }
 0x14d   :  { %419 = vperm.xlu2 %925, %v393_v11   ;;  %v401_v54 = vmul.f32 %v393_v11, %v1137_v6  ;;  %v396_v6 = vld [vmem:[%s1291_s4 + $0x8] sm:$0xff]  ;;  %s843_s4 = sshll.u32 %s1292_s5, 4  ;;  %s844_s4 = int_to_ptr.hbm [resolvable:$true] %s843_s4 }
 0x14e   :  { %v380_v20 = vmul.f32 0.5, %v379_v19  ;;  %v361_v21 = vsub.f32 1.5, %v360_v14 }
 0x14f   :  { %v935_v27 = vpop.eup %934 }
 0x150   :  { %v381_v28 = vsub.f32 1.5, %v380_v20  ;;  %v348_v29 = vmul.f32 %v935_v27, %v343_v2  ;;  %v362_v30 = vmul.f32 %v931_v1, %v361_v21  ;;  %vm354_vm10 = vweird.f32 %v935_v27 }
 0x151   :  { %vm355_vm12 = vmor %vm353_vm11, %vm354_vm10 }
 0x152   :  { %v382_v37 = vmul.f32 %v933_v7, %v381_v28  ;;  %v349_v38 = vmul.f32 %v935_v27, %v348_v29  ;;  %v366_v39 = vsel %vm365_vm7, %v931_v1, %v362_v30 }
 0x153   :  { %v392_v40 = vmul.f32 %v388_v31, %v366_v39 }
 0x154   :  { %v386_v42 = vsel %vm385_vm9, %v933_v7, %v382_v37  ;;  %v350_v45 = vmul.f32 0.5, %v349_v38 }
 0x155   :  { %v394_v46 = vmul.f32 %v390_v36, %v386_v42  ;;  %414 = vperm.xlu2 %925, %v392_v40   ;;  %v400_v60 = vmul.f32 %v392_v40, %v1141_v22  ;;  %v662_v42 = vld [vmem:[%s1289_s2 + $0x20] sm:$0xff] }
 0x156   :  { %v351_v49 = vsub.f32 1.5, %v350_v45  ;;  %v663_v45 = vld [vmem:[%s1289_s2 + $0x28] sm:$0xff] }
 0x157   :  { %v402_v50 = vmul.f32 %v394_v46, %v1145_v41  ;;  %424 = vperm.xlu1 %926, %v394_v46   ;;  %v405_v41 = vsub.f32 %v397_v56, %v401_v54  ;;  %v404_v62 = vsub.f32 %v396_v6, %v400_v60  ;;  %v664_v46 = vld [vmem:[%s1289_s2 + $0x30] sm:$0xff] }
 0x158   :  { %v352_v51 = vmul.f32 %v935_v27, %v351_v49  ;;  %v666_v49 = vld [vmem:[%s1289_s2 + $0x40] sm:$0xff] }
 0x159   :  { %v406_v53 = vsub.f32 %v398_v48, %v402_v50  ;;  %v665_v48 = vld [vmem:[%s1289_s2 + $0x38] sm:$0xff]  ;;  %v667_v50 = vld [vmem:[%s1289_s2 + $0x48] sm:$0xff] }
 0x15a   :  { %v356_v55 = vsel %vm355_vm12, %v935_v27, %v352_v51  ;;  %v668_v51 = vld [vmem:[%s1289_s2 + $0x50] sm:$0xff] }
 0x15b   :  { %452 = vperm.xlu0 %927, %v406_v53   ;;  %v391_v57 = vmul.f32 %v387_v52, %v356_v55  ;;  %v669_v52 = vld [vmem:[%s1289_s2 + $0x58] sm:$0xff] }
 0x15d   :  { %409 = vperm.xlu2 %925, %v391_v57   ;;  %v399_v58 = vmul.f32 %v391_v57, %v1149_v47 }
 0x15f   :  { %447 = vperm.xlu1 %926, %v405_v41   ;;  %v403_v61 = vsub.f32 %v395_v59, %v399_v58 }
 0x165   :  { %437 = vperm.xlu2 %925, %v403_v61  }
 0x167   :  { %442 = vperm.xlu1 %926, %v404_v62  }
 0x1a7   :  { %v420_v63 = vpop.permute.xlu2 %419 }
 0x1a8   :  { %v431_v11 = vmul.f32 %v420_v63, %v1081_v25  ;;  %v432_v14 = vmul.f32 %v420_v63, %v1083_v26 }
 0x1af   :  { %v415_v0 = vpop.permute.xlu2 %414 }
 0x1b0   :  { %v429_v25 = vmul.f32 %v415_v0, %v1067_v17  ;;  %v430_v27 = vmul.f32 %v415_v0, %v1069_v18  ;;  %v644_v26 = vmul.f32 %v415_v0, %v1077_v23 }
 0x1b7   :  { %v410_v10 = vpop.permute.xlu2 %409 }
 0x1b8   :  { %v427_v29 = vmul.f32 %v410_v10, %v1057_v12  ;;  %v428_v30 = vmul.f32 %v410_v10, %v1059_v13  ;;  %v642_v39 = vmul.f32 %v410_v10, %v1063_v15  ;;  %v643_v17 = vmul.f32 %v410_v10, %v1065_v16  ;;  %v658_v12 = vld [vmem:[%s1289_s2] sm:$0xff]  ;;  %v659_v13 = vld [vmem:[%s1289_s2 + $0x8] sm:$0xff]  ;;  %v660_v15 = vld [vmem:[%s1289_s2 + $0x10] sm:$0xff] }
 0x1b9   :  { %v661_v16 = vld [vmem:[%s1289_s2 + $0x18] sm:$0xff]  ;;  %s992_s2 = smov [#allocation5]  }
 0x1ba   :  { %s841_s19 = sshll.u32 %s992_s2, 4  ;;  %s842_s19 = int_to_ptr.vmem [resolvable:$true] %s841_s19 }
 0x1c9   :  { %v425_v1 = vpop.permute.xlu1 %424 }
 0x1ca   :  { %v433_v2 = vmul.f32 %v425_v1, %v1099_v34  ;;  %v434_v47 = vmul.f32 %v425_v1, %v1101_v35  ;;  %v648_v3 = vmul.f32 %v425_v1, %v1115_v43  ;;  %v649_v4 = vmul.f32 %v425_v1, %v1117_v44 }
 0x1cb   :  { %v646_v34 = vmul.f32 %v420_v63, %v1095_v32  ;;  %v647_v35 = vmul.f32 %v420_v63, %v1097_v33  ;;  %v645_v32 = vmul.f32 %v415_v0, %v1079_v24  ;;  %v438_v33 = vpop.permute.xlu2 %437 }
 0x1cc   :  { %v455_v18 = vadd.f32 %v438_v33, %v427_v29  ;;  %v456_v23 = vadd.f32 %v438_v33, %v428_v30  ;;  %v650_v24 = vadd.f32 %v642_v39, %v438_v33  ;;  %v651_v40 = vadd.f32 %v643_v17, %v438_v33 }
 0x1cd   :  { %v453_v22 = vpop.permute.xlu0 %452 }
 0x1ce   :  { %v461_v5 = vadd.f32 %v453_v22, %v433_v2  ;;  %v462_v7 = vadd.f32 %v453_v22, %v434_v47  ;;  %v656_v8 = vadd.f32 %v648_v3, %v453_v22  ;;  %v657_v9 = vadd.f32 %v649_v4, %v453_v22 }
 0x1d0   :  { %524 = vmatpush.msrb.mxu0 %v461_v5  ;;  %577 = vmatpush.msrb.mxu1 %v462_v7 }
 0x1d1   :  { %718 = vmatpush.msrb.mxu2 %v656_v8  ;;  %771 = vmatpush.msrb.mxu3 %v657_v9  ;;  %v448_v43 = vpop.permute.xlu1 %447 }
 0x1d2   :  { %v459_v44 = vadd.f32 %v448_v43, %v431_v11  ;;  %v460_v19 = vadd.f32 %v448_v43, %v432_v14  ;;  %v654_v20 = vadd.f32 %v646_v34, %v448_v43  ;;  %v655_v21 = vadd.f32 %v647_v35, %v448_v43 }
 0x1d4   :  { %525 = vmatpush.msrb.mxu0 %v459_v44  ;;  %578 = vmatpush.msrb.mxu1 %v460_v19 }
 0x1d5   :  { %719 = vmatpush.msrb.mxu2 %v654_v20  ;;  %772 = vmatpush.msrb.mxu3 %v655_v21 }
 0x1d9   :  { %v443_v28 = vpop.permute.xlu1 %442 }
 0x1da   :  { %v457_v31 = vadd.f32 %v443_v28, %v429_v25  ;;  %v458_v36 = vadd.f32 %v443_v28, %v430_v27  ;;  %v652_v37 = vadd.f32 %v644_v26, %v443_v28  ;;  %v653_v38 = vadd.f32 %v645_v32, %v443_v28 }
 0x1dc   :  { %526 = vmatpush.msrb.mxu0 %v457_v31  ;;  %579 = vmatpush.msrb.mxu1 %v458_v36 }
 0x1dd   :  { %720 = vmatpush.msrb.mxu2 %v652_v37  ;;  %773 = vmatpush.msrb.mxu3 %v653_v38 }
 0x1de   :  { %527 = vmatpush.msrb.mxu0 %v455_v18  ;;  %580 = vmatpush.msrb.mxu1 %v456_v23 }
 0x1df   :  { %721 = vmatpush.msrb.mxu2 %v650_v24  ;;  %774 = vmatpush.msrb.mxu3 %v651_v40 }
 0x1e0   :  { %896 = vmatmul.msk.f32.vlgmr.msrb.gmra.mxu2 %vm475_vm13, %v658_v12  ;;  %908 = vmatmul.msk.f32.vlgmr.msrb.gmra.mxu3 %vm475_vm13, %v658_v12 }
 0x1e1   :  { %872 = vmatmul.msk.f32.vlgmr.msrb.gmra.mxu0 %vm475_vm13, %v658_v12  ;;  %884 = vmatmul.msk.f32.vlgmr.msrb.gmra.mxu1 %vm475_vm13, %v658_v12 }
 0x1e8   :  { %897 = vmatmul.msk.f32.gmra.mxu2 %vm475_vm13, %v659_v13  ;;  %909 = vmatmul.msk.f32.gmra.mxu3 %vm475_vm13, %v659_v13 }
 0x1e9   :  { %873 = vmatmul.msk.f32.gmra.mxu0 %vm475_vm13, %v659_v13  ;;  %885 = vmatmul.msk.f32.gmra.mxu1 %vm475_vm13, %v659_v13 }
 0x1f0   :  { %898 = vmatmul.msk.f32.gmra.mxu2 %vm475_vm13, %v660_v15  ;;  %910 = vmatmul.msk.f32.gmra.mxu3 %vm475_vm13, %v660_v15 }
 0x1f1   :  { %874 = vmatmul.msk.f32.gmra.mxu0 %vm475_vm13, %v660_v15  ;;  %886 = vmatmul.msk.f32.gmra.mxu1 %vm475_vm13, %v660_v15 }
 0x1f8   :  { %899 = vmatmul.msk.f32.gmra.mxu2 %vm475_vm13, %v661_v16  ;;  %911 = vmatmul.msk.f32.gmra.mxu3 %vm475_vm13, %v661_v16 }
 0x1f9   :  { %875 = vmatmul.msk.f32.gmra.mxu0 %vm475_vm13, %v661_v16  ;;  %887 = vmatmul.msk.f32.gmra.mxu1 %vm475_vm13, %v661_v16 }
 0x200   :  { %900 = vmatmul.msk.f32.gmra.mxu2 %vm475_vm13, %v662_v42  ;;  %912 = vmatmul.msk.f32.gmra.mxu3 %vm475_vm13, %v662_v42 }
 0x201   :  { %876 = vmatmul.msk.f32.gmra.mxu0 %vm475_vm13, %v662_v42  ;;  %888 = vmatmul.msk.f32.gmra.mxu1 %vm475_vm13, %v662_v42 }
 0x208   :  { %901 = vmatmul.msk.f32.gmra.mxu2 %vm475_vm13, %v663_v45  ;;  %913 = vmatmul.msk.f32.gmra.mxu3 %vm475_vm13, %v663_v45 }
 0x209   :  { %877 = vmatmul.msk.f32.gmra.mxu0 %vm475_vm13, %v663_v45  ;;  %889 = vmatmul.msk.f32.gmra.mxu1 %vm475_vm13, %v663_v45 }
 0x210   :  { %902 = vmatmul.msk.f32.gmra.mxu2 %vm475_vm13, %v664_v46  ;;  %914 = vmatmul.msk.f32.gmra.mxu3 %vm475_vm13, %v664_v46 }
 0x211   :  { %878 = vmatmul.msk.f32.gmra.mxu0 %vm475_vm13, %v664_v46  ;;  %890 = vmatmul.msk.f32.gmra.mxu1 %vm475_vm13, %v664_v46 }
 0x218   :  { %903 = vmatmul.msk.f32.gmra.mxu2 %vm475_vm13, %v665_v48  ;;  %915 = vmatmul.msk.f32.gmra.mxu3 %vm475_vm13, %v665_v48 }
 0x219   :  { %879 = vmatmul.msk.f32.gmra.mxu0 %vm475_vm13, %v665_v48  ;;  %891 = vmatmul.msk.f32.gmra.mxu1 %vm475_vm13, %v665_v48 }
 0x220   :  { %904 = vmatmul.msk.f32.gmra.mxu2 %vm475_vm13, %v666_v49  ;;  %916 = vmatmul.msk.f32.gmra.mxu3 %vm475_vm13, %v666_v49 }
 0x221   :  { %880 = vmatmul.msk.f32.gmra.mxu0 %vm475_vm13, %v666_v49  ;;  %892 = vmatmul.msk.f32.gmra.mxu1 %vm475_vm13, %v666_v49 }
 0x228   :  { %905 = vmatmul.msk.f32.gmra.mxu2 %vm475_vm13, %v667_v50  ;;  %917 = vmatmul.msk.f32.gmra.mxu3 %vm475_vm13, %v667_v50 }
 0x229   :  { %881 = vmatmul.msk.f32.gmra.mxu0 %vm475_vm13, %v667_v50  ;;  %893 = vmatmul.msk.f32.gmra.mxu1 %vm475_vm13, %v667_v50 }
 0x230   :  { %906 = vmatmul.msk.f32.gmra.mxu2 %vm475_vm13, %v668_v51  ;;  %918 = vmatmul.msk.f32.gmra.mxu3 %vm475_vm13, %v668_v51 }
 0x231   :  { %882 = vmatmul.msk.f32.gmra.mxu0 %vm475_vm13, %v668_v51  ;;  %894 = vmatmul.msk.f32.gmra.mxu1 %vm475_vm13, %v668_v51 }
 0x238   :  { %907 = vmatmul.msk.f32.gmra.mxu2 %vm475_vm13, %v669_v52  ;;  %919 = vmatmul.msk.f32.gmra.mxu3 %vm475_vm13, %v669_v52 }
 0x239   :  { %883 = vmatmul.msk.f32.gmra.mxu0 %vm475_vm13, %v669_v52  ;;  %895 = vmatmul.msk.f32.gmra.mxu1 %vm475_vm13, %v669_v52 }
 0x25e   :  { %v529_v53 = vpop.f32.mrf.mxu0  ;;  %v582_v54 = vpop.f32.mrf.mxu1 }
 0x25f   :  { %618 = vst [vmem:[#allocation5] sm:$0xff] %v529_v53 }
 0x260   :  { %619 = vst [vmem:[#allocation5 + $0x8] sm:$0xff] %v582_v54 }
 0x263   :  { %v723_v55 = vpop.f32.mrf.mxu2  ;;  %v776_v56 = vpop.f32.mrf.mxu3 }
 0x264   :  { %813 = vst [vmem:[#allocation5 + $0xc0] sm:$0xff] %v723_v55 }
 0x265   :  { %814 = vst [vmem:[#allocation5 + $0xc8] sm:$0xff] %v776_v56 }
 0x266   :  { %v532_v57 = vpop.f32.mrf.mxu0  ;;  %v585_v41 = vpop.f32.mrf.mxu1 }
 0x267   :  { %620 = vst [vmem:[#allocation5 + $0x10] sm:$0xff] %v532_v57 }
 0x268   :  { %621 = vst [vmem:[#allocation5 + $0x18] sm:$0xff] %v585_v41 }
 0x26b   :  { %v726_v58 = vpop.f32.mrf.mxu2  ;;  %v779_v59 = vpop.f32.mrf.mxu3 }
 0x26c   :  { %815 = vst [vmem:[#allocation5 + $0xd0] sm:$0xff] %v726_v58 }
 0x26d   :  { %816 = vst [vmem:[#allocation5 + $0xd8] sm:$0xff] %v779_v59 }
 0x26e   :  { %v535_v60 = vpop.f32.mrf.mxu0  ;;  %v588_v6 = vpop.f32.mrf.mxu1 }
 0x26f   :  { %622 = vst [vmem:[#allocation5 + $0x20] sm:$0xff] %v535_v60 }
 0x270   :  { %623 = vst [vmem:[#allocation5 + $0x28] sm:$0xff] %v588_v6 }
 0x273   :  { %v729_v61 = vpop.f32.mrf.mxu2  ;;  %v782_v62 = vpop.f32.mrf.mxu3 }
 0x274   :  { %817 = vst [vmem:[#allocation5 + $0xe0] sm:$0xff] %v729_v61 }
 0x275   :  { %818 = vst [vmem:[#allocation5 + $0xe8] sm:$0xff] %v782_v62 }
 0x276   :  { %v538_v63 = vpop.f32.mrf.mxu0  ;;  %v591_v0 = vpop.f32.mrf.mxu1 }
 0x277   :  { %624 = vst [vmem:[#allocation5 + $0x30] sm:$0xff] %v538_v63 }
 0x278   :  { %625 = vst [vmem:[#allocation5 + $0x38] sm:$0xff] %v591_v0 }
 0x27b   :  { %v732_v1 = vpop.f32.mrf.mxu2  ;;  %v785_v2 = vpop.f32.mrf.mxu3 }
 0x27c   :  { %819 = vst [vmem:[#allocation5 + $0xf0] sm:$0xff] %v732_v1 }
 0x27d   :  { %820 = vst [vmem:[#allocation5 + $0xf8] sm:$0xff] %v785_v2 }
 0x27e   :  { %v541_v47 = vpop.f32.mrf.mxu0  ;;  %v594_v3 = vpop.f32.mrf.mxu1 }
 0x27f   :  { %626 = vst [vmem:[#allocation5 + $0x40] sm:$0xff] %v541_v47 }
 0x280   :  { %627 = vst [vmem:[#allocation5 + $0x48] sm:$0xff] %v594_v3 }
 0x283   :  { %v735_v4 = vpop.f32.mrf.mxu2  ;;  %v788_v22 = vpop.f32.mrf.mxu3 }
 0x284   :  { %821 = vst [vmem:[#allocation5 + $0x100] sm:$0xff] %v735_v4 }
 0x285   :  { %822 = vst [vmem:[#allocation5 + $0x108] sm:$0xff] %v788_v22 }
 0x286   :  { %v544_v5 = vpop.f32.mrf.mxu0  ;;  %v597_v7 = vpop.f32.mrf.mxu1 }
 0x287   :  { %628 = vst [vmem:[#allocation5 + $0x50] sm:$0xff] %v544_v5 }
 0x288   :  { %629 = vst [vmem:[#allocation5 + $0x58] sm:$0xff] %v597_v7 }
 0x28b   :  { %v738_v8 = vpop.f32.mrf.mxu2  ;;  %v791_v9 = vpop.f32.mrf.mxu3 }
 0x28c   :  { %823 = vst [vmem:[#allocation5 + $0x110] sm:$0xff] %v738_v8 }
 0x28d   :  { %824 = vst [vmem:[#allocation5 + $0x118] sm:$0xff] %v791_v9 }
 0x28e   :  { %v547_v10 = vpop.f32.mrf.mxu0  ;;  %v600_v11 = vpop.f32.mrf.mxu1 }
 0x28f   :  { %630 = vst [vmem:[#allocation5 + $0x60] sm:$0xff] %v547_v10 }
 0x290   :  { %631 = vst [vmem:[#allocation5 + $0x68] sm:$0xff] %v600_v11 }
 0x293   :  { %v741_v14 = vpop.f32.mrf.mxu2  ;;  %v794_v34 = vpop.f32.mrf.mxu3 }
 0x294   :  { %825 = vst [vmem:[#allocation5 + $0x120] sm:$0xff] %v741_v14 }
 0x295   :  { %826 = vst [vmem:[#allocation5 + $0x128] sm:$0xff] %v794_v34 }
 0x296   :  { %v550_v35 = vpop.f32.mrf.mxu0  ;;  %v603_v43 = vpop.f32.mrf.mxu1 }
 0x297   :  { %632 = vst [vmem:[#allocation5 + $0x70] sm:$0xff] %v550_v35 }
 0x298   :  { %633 = vst [vmem:[#allocation5 + $0x78] sm:$0xff] %v603_v43 }
 0x29b   :  { %v744_v44 = vpop.f32.mrf.mxu2  ;;  %v797_v19 = vpop.f32.mrf.mxu3 }
 0x29c   :  { %827 = vst [vmem:[#allocation5 + $0x130] sm:$0xff] %v744_v44 }
 0x29d   :  { %828 = vst [vmem:[#allocation5 + $0x138] sm:$0xff] %v797_v19 }
 0x29e   :  { %v553_v20 = vpop.f32.mrf.mxu0  ;;  %v606_v21 = vpop.f32.mrf.mxu1 }
 0x29f   :  { %634 = vst [vmem:[#allocation5 + $0x80] sm:$0xff] %v553_v20 }
 0x2a0   :  { %635 = vst [vmem:[#allocation5 + $0x88] sm:$0xff] %v606_v21 }
 0x2a3   :  { %v747_v25 = vpop.f32.mrf.mxu2  ;;  %v800_v27 = vpop.f32.mrf.mxu3 }
 0x2a4   :  { %829 = vst [vmem:[#allocation5 + $0x140] sm:$0xff] %v747_v25 }
 0x2a5   :  { %830 = vst [vmem:[#allocation5 + $0x148] sm:$0xff] %v800_v27 }
 0x2a6   :  { %v556_v26 = vpop.f32.mrf.mxu0  ;;  %v609_v32 = vpop.f32.mrf.mxu1 }
 0x2a7   :  { %636 = vst [vmem:[#allocation5 + $0x90] sm:$0xff] %v556_v26 }
 0x2a8   :  { %637 = vst [vmem:[#allocation5 + $0x98] sm:$0xff] %v609_v32 }
 0x2ab   :  { %v750_v33 = vpop.f32.mrf.mxu2  ;;  %v803_v28 = vpop.f32.mrf.mxu3 }
 0x2ac   :  { %831 = vst [vmem:[#allocation5 + $0x150] sm:$0xff] %v750_v33 }
 0x2ad   :  { %832 = vst [vmem:[#allocation5 + $0x158] sm:$0xff] %v803_v28 }
 0x2ae   :  { %v559_v29 = vpop.f32.mrf.mxu0  ;;  %v612_v30 = vpop.f32.mrf.mxu1 }
 0x2af   :  { %638 = vst [vmem:[#allocation5 + $0xa0] sm:$0xff] %v559_v29 }
 0x2b0   :  { %639 = vst [vmem:[#allocation5 + $0xa8] sm:$0xff] %v612_v30 }
 0x2b3   :  { %v753_v31 = vpop.f32.mrf.mxu2  ;;  %v806_v36 = vpop.f32.mrf.mxu3 }
 0x2b4   :  { %833 = vst [vmem:[#allocation5 + $0x160] sm:$0xff] %v753_v31 }
 0x2b5   :  { %834 = vst [vmem:[#allocation5 + $0x168] sm:$0xff] %v806_v36 }
 0x2b6   :  { %v562_v37 = vpop.f32.mrf.mxu0  ;;  %v615_v38 = vpop.f32.mrf.mxu1 }
 0x2b7   :  { %640 = vst [vmem:[#allocation5 + $0xb0] sm:$0xff] %v562_v37 }
 0x2b8   :  { %641 = vst [vmem:[#allocation5 + $0xb8] sm:$0xff] %v615_v38 }
 0x2bb   :  { %v756_v39 = vpop.f32.mrf.mxu2  ;;  %v809_v17 = vpop.f32.mrf.mxu3 }
 0x2bc   :  { %835 = vst [vmem:[#allocation5 + $0x170] sm:$0xff] %v756_v39 }
 0x2bd   :  { %836 = vst [vmem:[#allocation5 + $0x178] sm:$0xff] %v809_v17 }
 0x2be   :  { %849 = dma.vmem_to_hbm [thread:$0]  %s842_s19, 6144, %s844_s4, [#allocation4], %s989_s23, %s989_s23, %s990_s24  }
 0x2bf   :  { %986 = dma.done.wait [#allocation4], 6144  }
 0x2c0   :  { %987 = vsyncadd [#allocation4], 4294961152 }
 0x2c1   :  { %854 = vsyncpa [#allocation3], 1 }
 0x2c2   :  { %855 = vsyncpa [#allocation4], 1 }

</bundles_post_ra>
